<compile_context>
chip_gen: v5e
topology: v5e:2x2
jax: 0.10.0
libtpu: 0.0.40
codegen_flags: <defaults>
</compile_context>

<pallas_src>
import jax
import jax.numpy as jnp
from jax import lax
from jax.experimental import pallas as pl
from jax.experimental.pallas import tpu as pltpu

LANE = 128
SUBLANE = 8
PAD_LABEL = -1                 # never matches a real class id (labels are >= 0)
MAX_HIST_TILE_ROWS = 2048      # 2048 x 128 int32 = 1 MiB of labels ingested per histogram step
MAX_MEMBER_TILE_ROWS = 4096    # 4096 x 128: 2 MiB int32 in + 0.5 MiB int8 out per membership step
HIST_CORE_SPLITS = 2           # leading "parallel" axis -> 2 partial histograms (v7x: one per TC)


def _round_up(x, m):
    return ((x + m - 1) // m) * m


def _cdiv(a, b):
    return -(-a // b)


# ---------------------------------------------------------------------------
# Kernel 1: lane-dense label histogram.
#   counts_ref is a resident (C, 8, 128) partial-count accumulator (P3 pattern):
#   zeroed when the inner ("arbitrary") reduction axis starts, accumulated with
#   pure VPU adds each step.  The final collapse to (C,) happens in the wrapper.
# ---------------------------------------------------------------------------
def _hist_kernel(labels_ref, counts_ref):
    @pl.when(pl.program_id(1) == 0)
    def _():
        counts_ref[...] = jnp.zeros_like(counts_ref)

    lab3 = labels_ref[...]                                # (TR//8, 8, 128) int32, pad = PAD_LABEL
    num_classes = counts_ref.shape[0]
    for c in range(num_classes):                          # C is small -> fully unrolled
        eq = (lab3 == c).astype(jnp.int32)                # constant-broadcast compares (VPU)
        counts_ref[c, :, :] += jnp.sum(eq, axis=0)        # fold leading axis: cross-vreg VPU adds


def label_histogram_packed(packed3, train_rows, num_classes, tile_rows, splits):
    """packed3: (R//8, 8, 128) int32 view of the label slab; train labels occupy rows
    [0, train_rows) of the 2-D view (pad = PAD_LABEL).  train_rows must be a multiple of
    splits * tile_rows.  Returns (num_classes,) int32 counts."""
    steps = train_rows // (splits * tile_rows)
    g = tile_rows // SUBLANE
    partial = pl.pallas_call(
        _hist_kernel,
        grid=(splits, steps),
        in_specs=[pl.BlockSpec((g, SUBLANE, LANE),
                               lambda p, i: (p * steps + i, 0, 0))],
        out_specs=pl.BlockSpec((num_classes, SUBLANE, LANE),
                               lambda p, i: (p, 0, 0)),     # resident across the inner axis
        out_shape=jax.ShapeDtypeStruct((splits * num_classes, SUBLANE, LANE), jnp.int32),
        compiler_params=pltpu.CompilerParams(
            dimension_semantics=("parallel", "arbitrary")),
    )(packed3)
    # Tiny final reduce (splits * C * 1024 ints) stays in XLA.
    return partial.reshape(splits, num_classes, SUBLANE, LANE).sum(axis=(0, 2, 3)).astype(jnp.int32)


# ---------------------------------------------------------------------------
# Kernel 2: lane-dense membership mask (int8 output).
#   mask[r, l] = OR_j (labels[r, l] == topk[j]); topk[j] passed as SMEM scalars.
# ---------------------------------------------------------------------------
def _member_kernel(topk_ref, labels_ref, mask_ref):
    lab = labels_ref[...]                                 # (TR, 128) int32, pad = PAD_LABEL
    hit = jnp.zeros(lab.shape, dtype=jnp.bool_)
    for j in range(topk_ref.shape[0]):                    # K is tiny -> fully unrolled
        t = topk_ref[j]                                   # scalar read from SMEM
        t = jnp.where(t >= 0, t, jnp.int32(-2))           # unused slot -> sentinel != PAD_LABEL
        hit = jnp.logical_or(hit, lab == t)               # scalar-broadcast compare (VPU)
    mask_ref[...] = hit.astype(jnp.int8)                  # lane-dense 1-byte stores


def membership_mask_packed(packed2, topk_arr, tile_rows):
    """packed2: (R, 128) int32 slab (R multiple of tile_rows).  Returns (R*128,) int8 mask."""
    r_pad = packed2.shape[0]
    # TODO(synk): optionally add pipeline_mode=pl.Buffered(3) on these specs; compute per tile
    # (K compares) is negligible so default double-buffering already overlaps DMA well.
    mask2d = pl.pallas_call(
        _member_kernel,
        grid_spec=pltpu.PrefetchScalarGridSpec(
            num_scalar_prefetch=1,
            grid=(r_pad // tile_rows,),
            in_specs=[pl.BlockSpec((tile_rows, LANE), lambda i, tk: (i, 0))],
            out_specs=pl.BlockSpec((tile_rows, LANE), lambda i, tk: (i, 0)),
        ),
        out_shape=jax.ShapeDtypeStruct((r_pad, LANE), jnp.int8),
        compiler_params=pltpu.CompilerParams(dimension_semantics=("parallel",)),
    )(topk_arr.astype(jnp.int32), packed2)
    return mask2d.reshape(-1)


# ---------------------------------------------------------------------------
# Module wrapper (forward pass of SubsetDatasetsByTopFreq)
# ---------------------------------------------------------------------------
class SubsetDatasetsByTopFreq:
    def __init__(self, topk=5, num_classes=10):
        self.topk = topk
        self.num_classes = num_classes

    def _pack_and_plan(self, datasets):
        """Pack every dataset's labels into ONE lane-dense (R, 128) int32 slab with a single
        concatenate (train first, padded to the histogram grid boundary with PAD_LABEL)."""
        names = list(datasets.keys())
        order = ["train"] + [n for n in names if n != "train"]
        sizes = {n: int(datasets[n]["labels"].shape[0]) for n in order}

        # Histogram tiling over the train section (2-way core split, 8-row sublane alignment).
        n_train = sizes["train"]
        train_rows = max(1, _cdiv(n_train, LANE))
        splits = HIST_CORE_SPLITS
        tr_hist = min(MAX_HIST_TILE_ROWS, _round_up(_cdiv(train_rows, splits), SUBLANE))
        train_rows_pad = _round_up(train_rows, splits * tr_hist)

        # Membership tiling over the whole slab (tile rows multiple of 32 for int8 packing;
        # sized so large inputs give >= 2 "parallel" steps for v7x megacore).
        rest_elems = sum(sizes[n] for n in order[1:])
        total_rows = train_rows_pad + _cdiv(rest_elems, LANE)
        tr_mem = min(MAX_MEMBER_TILE_ROWS, _round_up(max(_cdiv(total_rows, 2), 1), 32))
        total_rows_pad = _round_up(total_rows, tr_mem)

        # Single-pass packing: [train | pad to hist boundary | other datasets | tail pad].
        parts = [datasets["train"]["labels"].astype(jnp.int32).reshape(-1)]
        pad_train = train_rows_pad * LANE - n_train
        if pad_train:
            parts.append(jnp.full((pad_train,), PAD_LABEL, jnp.int32))
        offsets = {"train": 0}
        elem = train_rows_pad * LANE
        for n in order[1:]:
            offsets[n] = elem
            parts.append(datasets[n]["labels"].astype(jnp.int32).reshape(-1))
            elem += sizes[n]
        tail = total_rows_pad * LANE - elem
        if tail:
            parts.append(jnp.full((tail,), PAD_LABEL, jnp.int32))
        flat = jnp.concatenate(parts)
        packed2 = flat.reshape(total_rows_pad, LANE)                       # free view
        packed3 = flat.reshape(total_rows_pad // SUBLANE, SUBLANE, LANE)   # free view
        return packed2, packed3, offsets, sizes, train_rows_pad, tr_hist, splits, tr_mem

    def get_topk_labels(self, packed3, train_rows_pad, tr_hist, splits):
        counts = label_histogram_packed(packed3, train_rows_pad, self.num_classes, tr_hist, splits)
        k = min(self.topk, self.num_classes)
        vals, idxs = lax.top_k(counts, k)                 # ties -> smaller label id
        # Labels with zero count never appear in Counter -> mark slot unused with -1.
        # TODO(synk): exact tie-order parity with Python Counter (first-occurrence) not reproduced.
        return jnp.where(vals > 0, idxs, -1).astype(jnp.int32)   # (k,)

    def _subset(self, features, labels, mask):
        # dataset.subset(split_indices): gather kept rows to the front, pad the rest.
        # TODO(synk): dynamic-size compaction (nonzero + gather) stays in XLA; a Pallas
        # prefix-sum/scatter compaction would only pay off for very large feature matrices.
        n = labels.shape[0]
        mask_i32 = mask.astype(jnp.int32)
        idx = jnp.nonzero(mask_i32, size=n, fill_value=n)[0]
        keep = idx < n
        safe = jnp.where(keep, idx, 0)
        sub_feats = jnp.where(keep[:, None], features[safe], 0.0)
        sub_labels = jnp.where(keep, labels[safe], -1)
        return {"features": sub_feats, "labels": sub_labels,
                "num_selected": jnp.sum(mask_i32), "mask": mask}

    def forward(self, datasets):
        (packed2, packed3, offsets, sizes,
         train_rows_pad, tr_hist, splits, tr_mem) = self._pack_and_plan(datasets)
        topk_arr = self.get_topk_labels(packed3, train_rows_pad, tr_hist, splits)
        # One batched membership kernel call over the shared slab (covers all datasets).
        flat_mask = membership_mask_packed(packed2, topk_arr, tr_mem)
        out = {}
        for name in datasets:
            off, sz = offsets[name], sizes[name]
            mask = flat_mask[off:off + sz]
            out[name] = self._subset(datasets[name]["features"], datasets[name]["labels"], mask)
        out["_topk_labels"] = topk_arr
        return out


# ---------------------------------------------------------------------------
if __name__ == "__main__":
    import numpy as np

    key = jax.random.PRNGKey(0)
    num_classes, topk, feat_dim = 10, 5, 16

    k1, k2, k3, k4, k5, k6 = jax.random.split(key, 6)
    datasets = {
        "train": {
            "labels": jax.random.randint(k1, (128,), 0, num_classes, dtype=jnp.int32),
            "features": jax.random.normal(k2, (128, feat_dim), dtype=jnp.float32),
        },
        "val": {
            "labels": jax.random.randint(k3, (64,), 0, num_classes, dtype=jnp.int32),
            "features": jax.random.normal(k4, (64, feat_dim), dtype=jnp.float32),
        },
        "test": {
            "labels": jax.random.randint(k5, (64,), 0, num_classes, dtype=jnp.int32),
            "features": jax.random.normal(k6, (64, feat_dim), dtype=jnp.float32),
        },
    }

    splitter = SubsetDatasetsByTopFreq(topk=topk, num_classes=num_classes)
    result = jax.block_until_ready(splitter.forward(datasets))

    # Reference checks against numpy Counter-style semantics.
    train_np = np.asarray(datasets["train"]["labels"])
    counts_np = np.bincount(train_np, minlength=num_classes)
    topk_set = set(int(v) for v in result["_topk_labels"] if int(v) >= 0)
    kernel_counts = sorted((int(counts_np[l]) for l in topk_set), reverse=True)
    ref_counts = sorted((int(c) for c in counts_np if c > 0), reverse=True)[:len(topk_set)]
    assert kernel_counts == ref_counts, "top-k selection mismatch"

    for ds_type, ds in datasets.items():
        labels_np = np.asarray(ds["labels"])
        ref_mask = np.array([1 if int(l) in topk_set else 0 for l in labels_np], dtype=np.int32)
        got_mask = np.asarray(result[ds_type]["mask"]).astype(np.int32)
        assert np.array_equal(ref_mask, got_mask), f"mask mismatch for {ds_type}"
        assert int(result[ds_type]["num_selected"]) == int(ref_mask.sum())
        ref_idx = np.nonzero(ref_mask)[0]
        got_labels = np.asarray(result[ds_type]["labels"])[:len(ref_idx)]
        assert np.array_equal(got_labels, labels_np[ref_idx]), f"subset mismatch for {ds_type}"

    print("KERNEL_OK")
</pallas_src>

<mosaic_0001>
module attributes {stable_mosaic.version = 11 : i64} {
  func.func @_hist_kernel(%arg0: i32, %arg1: i32, %arg2: memref<1x8x128xi32, #tpu.memory_space<vmem>>, %arg3: memref<10x8x128xi32, #tpu.memory_space<vmem>>) attributes {dimension_semantics = [#tpu.dimension_semantics<parallel>, #tpu.dimension_semantics<arbitrary>], iteration_bounds = array<i64: 2, 1>, scalar_prefetch = 0 : i64, scratch_operands = 0 : i64, tpu.core_type = #tpu.core_type<tc>, window_params = [{transform_indices = @transform_0, window_bounds = array<i64: 1, 8, 128>}, {transform_indices = @transform_1, window_bounds = array<i64: 10, 8, 128>}]} {
    %c0_i32 = arith.constant 0 : i32
    %0 = arith.cmpi eq, %arg1, %c0_i32 : i32
    %1 = arith.extui %0 : i1 to i32
    %c0_i32_0 = arith.constant 0 : i32
    %2 = arith.cmpi ne, %1, %c0_i32_0 : i32
    scf.if %2 {
      %c0_i32_64 = arith.constant 0 : i32
      %104 = vector.broadcast %c0_i32_64 : i32 to vector<10x8x128xi32>
      %c0_65 = arith.constant 0 : index
      %c0_66 = arith.constant 0 : index
      %c0_67 = arith.constant 0 : index
      %105 = vector.load %arg3[%c0_65, %c0_66, %c0_67] : memref<10x8x128xi32, #tpu.memory_space<vmem>>, vector<10x8x128xi32>
      tpu.vector_store %arg3[%c0_65, %c0_66, %c0_67], %104 {strides = array<i32>} : memref<10x8x128xi32, #tpu.memory_space<vmem>>, vector<10x8x128xi32>,
    } else {
    }
    %c0 = arith.constant 0 : index
    %c0_1 = arith.constant 0 : index
    %c0_2 = arith.constant 0 : index
    %3 = vector.load %arg2[%c0, %c0_1, %c0_2] : memref<1x8x128xi32, #tpu.memory_space<vmem>>, vector<1x8x128xi32>
    %c0_i32_3 = arith.constant 0 : i32
    %4 = vector.broadcast %c0_i32_3 : i32 to vector<1x8x128xi32>
    %5 = arith.cmpi eq, %3, %4 : vector<1x8x128xi32>
    %6 = arith.extui %5 : vector<1x8x128xi1> to vector<1x8x128xi32>
    %c0_4 = arith.constant 0 : index
    %c0_5 = arith.constant 0 : index
    %c0_6 = arith.constant 0 : index
    %7 = vector.load %arg3[%c0_4, %c0_5, %c0_6] : memref<10x8x128xi32, #tpu.memory_space<vmem>>, vector<1x8x128xi32>
    %8 = vector.shape_cast %7 : vector<1x8x128xi32> to vector<8x128xi32>
    %cst = arith.constant dense<0> : vector<8x128xi32>
    %9 = vector.multi_reduction <add>, %6, %cst [0] : vector<1x8x128xi32> to vector<8x128xi32>
    %10 = arith.addi %8, %9 : vector<8x128xi32>
    %c0_7 = arith.constant 0 : index
    %c0_8 = arith.constant 0 : index
    %c0_9 = arith.constant 0 : index
    %11 = vector.load %arg3[%c0_7, %c0_8, %c0_9] : memref<10x8x128xi32, #tpu.memory_space<vmem>>, vector<1x8x128xi32>
    %12 = vector.shape_cast %11 : vector<1x8x128xi32> to vector<8x128xi32>
    %13 = vector.shape_cast %10 : vector<8x128xi32> to vector<1x8x128xi32>
    tpu.vector_store %arg3[%c0_7, %c0_8, %c0_9], %13 {strides = array<i32>} : memref<10x8x128xi32, #tpu.memory_space<vmem>>, vector<1x8x128xi32>,
    %c1_i32 = arith.constant 1 : i32
    %14 = vector.broadcast %c1_i32 : i32 to vector<1x8x128xi32>
    %15 = arith.cmpi eq, %3, %14 : vector<1x8x128xi32>
    %16 = arith.extui %15 : vector<1x8x128xi1> to vector<1x8x128xi32>
    %c1 = arith.constant 1 : index
    %c0_10 = arith.constant 0 : index
    %c0_11 = arith.constant 0 : index
    %17 = vector.load %arg3[%c1, %c0_10, %c0_11] : memref<10x8x128xi32, #tpu.memory_space<vmem>>, vector<1x8x128xi32>
    %18 = vector.shape_cast %17 : vector<1x8x128xi32> to vector<8x128xi32>
    %cst_12 = arith.constant dense<0> : vector<8x128xi32>
    %19 = vector.multi_reduction <add>, %16, %cst_12 [0] : vector<1x8x128xi32> to vector<8x128xi32>
    %20 = arith.addi %18, %19 : vector<8x128xi32>
    %c1_13 = arith.constant 1 : index
    %c0_14 = arith.constant 0 : index
    %c0_15 = arith.constant 0 : index
    %21 = vector.load %arg3[%c1_13, %c0_14, %c0_15] : memref<10x8x128xi32, #tpu.memory_space<vmem>>, vector<1x8x128xi32>
    %22 = vector.shape_cast %21 : vector<1x8x128xi32> to vector<8x128xi32>
    %23 = vector.shape_cast %20 : vector<8x128xi32> to vector<1x8x128xi32>
    tpu.vector_store %arg3[%c1_13, %c0_14, %c0_15], %23 {strides = array<i32>} : memref<10x8x128xi32, #tpu.memory_space<vmem>>, vector<1x8x128xi32>,
    %c2_i32 = arith.constant 2 : i32
    %24 = vector.broadcast %c2_i32 : i32 to vector<1x8x128xi32>
    %25 = arith.cmpi eq, %3, %24 : vector<1x8x128xi32>
    %26 = arith.extui %25 : vector<1x8x128xi1> to vector<1x8x128xi32>
    %c2 = arith.constant 2 : index
    %c0_16 = arith.constant 0 : index
    %c0_17 = arith.constant 0 : index
    %27 = vector.load %arg3[%c2, %c0_16, %c0_17] : memref<10x8x128xi32, #tpu.memory_space<vmem>>, vector<1x8x128xi32>
    %28 = vector.shape_cast %27 : vector<1x8x128xi32> to vector<8x128xi32>
    %cst_18 = arith.constant dense<0> : vector<8x128xi32>
    %29 = vector.multi_reduction <add>, %26, %cst_18 [0] : vector<1x8x128xi32> to vector<8x128xi32>
    %30 = arith.addi %28, %29 : vector<8x128xi32>
    %c2_19 = arith.constant 2 : index
    %c0_20 = arith.constant 0 : index
    %c0_21 = arith.constant 0 : index
    %31 = vector.load %arg3[%c2_19, %c0_20, %c0_21] : memref<10x8x128xi32, #tpu.memory_space<vmem>>, vector<1x8x128xi32>
    %32 = vector.shape_cast %31 : vector<1x8x128xi32> to vector<8x128xi32>
    %33 = vector.shape_cast %30 : vector<8x128xi32> to vector<1x8x128xi32>
    tpu.vector_store %arg3[%c2_19, %c0_20, %c0_21], %33 {strides = array<i32>} : memref<10x8x128xi32, #tpu.memory_space<vmem>>, vector<1x8x128xi32>,
    %c3_i32 = arith.constant 3 : i32
    %34 = vector.broadcast %c3_i32 : i32 to vector<1x8x128xi32>
    %35 = arith.cmpi eq, %3, %34 : vector<1x8x128xi32>
    %36 = arith.extui %35 : vector<1x8x128xi1> to vector<1x8x128xi32>
    %c3 = arith.constant 3 : index
    %c0_22 = arith.constant 0 : index
    %c0_23 = arith.constant 0 : index
    %37 = vector.load %arg3[%c3, %c0_22, %c0_23] : memref<10x8x128xi32, #tpu.memory_space<vmem>>, vector<1x8x128xi32>
    %38 = vector.shape_cast %37 : vector<1x8x128xi32> to vector<8x128xi32>
    %cst_24 = arith.constant dense<0> : vector<8x128xi32>
    %39 = vector.multi_reduction <add>, %36, %cst_24 [0] : vector<1x8x128xi32> to vector<8x128xi32>
    %40 = arith.addi %38, %39 : vector<8x128xi32>
    %c3_25 = arith.constant 3 : index
    %c0_26 = arith.constant 0 : index
    %c0_27 = arith.constant 0 : index
    %41 = vector.load %arg3[%c3_25, %c0_26, %c0_27] : memref<10x8x128xi32, #tpu.memory_space<vmem>>, vector<1x8x128xi32>
    %42 = vector.shape_cast %41 : vector<1x8x128xi32> to vector<8x128xi32>
    %43 = vector.shape_cast %40 : vector<8x128xi32> to vector<1x8x128xi32>
    tpu.vector_store %arg3[%c3_25, %c0_26, %c0_27], %43 {strides = array<i32>} : memref<10x8x128xi32, #tpu.memory_space<vmem>>, vector<1x8x128xi32>,
    %c4_i32 = arith.constant 4 : i32
    %44 = vector.broadcast %c4_i32 : i32 to vector<1x8x128xi32>
    %45 = arith.cmpi eq, %3, %44 : vector<1x8x128xi32>
    %46 = arith.extui %45 : vector<1x8x128xi1> to vector<1x8x128xi32>
    %c4 = arith.constant 4 : index
    %c0_28 = arith.constant 0 : index
    %c0_29 = arith.constant 0 : index
    %47 = vector.load %arg3[%c4, %c0_28, %c0_29] : memref<10x8x128xi32, #tpu.memory_space<vmem>>, vector<1x8x128xi32>
    %48 = vector.shape_cast %47 : vector<1x8x128xi32> to vector<8x128xi32>
    %cst_30 = arith.constant dense<0> : vector<8x128xi32>
    %49 = vector.multi_reduction <add>, %46, %cst_30 [0] : vector<1x8x128xi32> to vector<8x128xi32>
    %50 = arith.addi %48, %49 : vector<8x128xi32>
    %c4_31 = arith.constant 4 : index
    %c0_32 = arith.constant 0 : index
    %c0_33 = arith.constant 0 : index
    %51 = vector.load %arg3[%c4_31, %c0_32, %c0_33] : memref<10x8x128xi32, #tpu.memory_space<vmem>>, vector<1x8x128xi32>
    %52 = vector.shape_cast %51 : vector<1x8x128xi32> to vector<8x128xi32>
    %53 = vector.shape_cast %50 : vector<8x128xi32> to vector<1x8x128xi32>
    tpu.vector_store %arg3[%c4_31, %c0_32, %c0_33], %53 {strides = array<i32>} : memref<10x8x128xi32, #tpu.memory_space<vmem>>, vector<1x8x128xi32>,
    %c5_i32 = arith.constant 5 : i32
    %54 = vector.broadcast %c5_i32 : i32 to vector<1x8x128xi32>
    %55 = arith.cmpi eq, %3, %54 : vector<1x8x128xi32>
    %56 = arith.extui %55 : vector<1x8x128xi1> to vector<1x8x128xi32>
    %c5 = arith.constant 5 : index
    %c0_34 = arith.constant 0 : index
    %c0_35 = arith.constant 0 : index
    %57 = vector.load %arg3[%c5, %c0_34, %c0_35] : memref<10x8x128xi32, #tpu.memory_space<vmem>>, vector<1x8x128xi32>
    %58 = vector.shape_cast %57 : vector<1x8x128xi32> to vector<8x128xi32>
    %cst_36 = arith.constant dense<0> : vector<8x128xi32>
    %59 = vector.multi_reduction <add>, %56, %cst_36 [0] : vector<1x8x128xi32> to vector<8x128xi32>
    %60 = arith.addi %58, %59 : vector<8x128xi32>
    %c5_37 = arith.constant 5 : index
    %c0_38 = arith.constant 0 : index
    %c0_39 = arith.constant 0 : index
    %61 = vector.load %arg3[%c5_37, %c0_38, %c0_39] : memref<10x8x128xi32, #tpu.memory_space<vmem>>, vector<1x8x128xi32>
    %62 = vector.shape_cast %61 : vector<1x8x128xi32> to vector<8x128xi32>
    %63 = vector.shape_cast %60 : vector<8x128xi32> to vector<1x8x128xi32>
    tpu.vector_store %arg3[%c5_37, %c0_38, %c0_39], %63 {strides = array<i32>} : memref<10x8x128xi32, #tpu.memory_space<vmem>>, vector<1x8x128xi32>,
    %c6_i32 = arith.constant 6 : i32
    %64 = vector.broadcast %c6_i32 : i32 to vector<1x8x128xi32>
    %65 = arith.cmpi eq, %3, %64 : vector<1x8x128xi32>
    %66 = arith.extui %65 : vector<1x8x128xi1> to vector<1x8x128xi32>
    %c6 = arith.constant 6 : index
    %c0_40 = arith.constant 0 : index
    %c0_41 = arith.constant 0 : index
    %67 = vector.load %arg3[%c6, %c0_40, %c0_41] : memref<10x8x128xi32, #tpu.memory_space<vmem>>, vector<1x8x128xi32>
    %68 = vector.shape_cast %67 : vector<1x8x128xi32> to vector<8x128xi32>
    %cst_42 = arith.constant dense<0> : vector<8x128xi32>
    %69 = vector.multi_reduction <add>, %66, %cst_42 [0] : vector<1x8x128xi32> to vector<8x128xi32>
    %70 = arith.addi %68, %69 : vector<8x128xi32>
    %c6_43 = arith.constant 6 : index
    %c0_44 = arith.constant 0 : index
    %c0_45 = arith.constant 0 : index
    %71 = vector.load %arg3[%c6_43, %c0_44, %c0_45] : memref<10x8x128xi32, #tpu.memory_space<vmem>>, vector<1x8x128xi32>
    %72 = vector.shape_cast %71 : vector<1x8x128xi32> to vector<8x128xi32>
    %73 = vector.shape_cast %70 : vector<8x128xi32> to vector<1x8x128xi32>
    tpu.vector_store %arg3[%c6_43, %c0_44, %c0_45], %73 {strides = array<i32>} : memref<10x8x128xi32, #tpu.memory_space<vmem>>, vector<1x8x128xi32>,
    %c7_i32 = arith.constant 7 : i32
    %74 = vector.broadcast %c7_i32 : i32 to vector<1x8x128xi32>
    %75 = arith.cmpi eq, %3, %74 : vector<1x8x128xi32>
    %76 = arith.extui %75 : vector<1x8x128xi1> to vector<1x8x128xi32>
    %c7 = arith.constant 7 : index
    %c0_46 = arith.constant 0 : index
    %c0_47 = arith.constant 0 : index
    %77 = vector.load %arg3[%c7, %c0_46, %c0_47] : memref<10x8x128xi32, #tpu.memory_space<vmem>>, vector<1x8x128xi32>
    %78 = vector.shape_cast %77 : vector<1x8x128xi32> to vector<8x128xi32>
    %cst_48 = arith.constant dense<0> : vector<8x128xi32>
    %79 = vector.multi_reduction <add>, %76, %cst_48 [0] : vector<1x8x128xi32> to vector<8x128xi32>
    %80 = arith.addi %78, %79 : vector<8x128xi32>
    %c7_49 = arith.constant 7 : index
    %c0_50 = arith.constant 0 : index
    %c0_51 = arith.constant 0 : index
    %81 = vector.load %arg3[%c7_49, %c0_50, %c0_51] : memref<10x8x128xi32, #tpu.memory_space<vmem>>, vector<1x8x128xi32>
    %82 = vector.shape_cast %81 : vector<1x8x128xi32> to vector<8x128xi32>
    %83 = vector.shape_cast %80 : vector<8x128xi32> to vector<1x8x128xi32>
    tpu.vector_store %arg3[%c7_49, %c0_50, %c0_51], %83 {strides = array<i32>} : memref<10x8x128xi32, #tpu.memory_space<vmem>>, vector<1x8x128xi32>,
    %c8_i32 = arith.constant 8 : i32
    %84 = vector.broadcast %c8_i32 : i32 to vector<1x8x128xi32>
    %85 = arith.cmpi eq, %3, %84 : vector<1x8x128xi32>
    %86 = arith.extui %85 : vector<1x8x128xi1> to vector<1x8x128xi32>
    %c8 = arith.constant 8 : index
    %c0_52 = arith.constant 0 : index
    %c0_53 = arith.constant 0 : index
    %87 = vector.load %arg3[%c8, %c0_52, %c0_53] : memref<10x8x128xi32, #tpu.memory_space<vmem>>, vector<1x8x128xi32>
    %88 = vector.shape_cast %87 : vector<1x8x128xi32> to vector<8x128xi32>
    %cst_54 = arith.constant dense<0> : vector<8x128xi32>
    %89 = vector.multi_reduction <add>, %86, %cst_54 [0] : vector<1x8x128xi32> to vector<8x128xi32>
    %90 = arith.addi %88, %89 : vector<8x128xi32>
    %c8_55 = arith.constant 8 : index
    %c0_56 = arith.constant 0 : index
    %c0_57 = arith.constant 0 : index
    %91 = vector.load %arg3[%c8_55, %c0_56, %c0_57] : memref<10x8x128xi32, #tpu.memory_space<vmem>>, vector<1x8x128xi32>
    %92 = vector.shape_cast %91 : vector<1x8x128xi32> to vector<8x128xi32>
    %93 = vector.shape_cast %90 : vector<8x128xi32> to vector<1x8x128xi32>
    tpu.vector_store %arg3[%c8_55, %c0_56, %c0_57], %93 {strides = array<i32>} : memref<10x8x128xi32, #tpu.memory_space<vmem>>, vector<1x8x128xi32>,
    %c9_i32 = arith.constant 9 : i32
    %94 = vector.broadcast %c9_i32 : i32 to vector<1x8x128xi32>
    %95 = arith.cmpi eq, %3, %94 : vector<1x8x128xi32>
    %96 = arith.extui %95 : vector<1x8x128xi1> to vector<1x8x128xi32>
    %c9 = arith.constant 9 : index
    %c0_58 = arith.constant 0 : index
    %c0_59 = arith.constant 0 : index
    %97 = vector.load %arg3[%c9, %c0_58, %c0_59] : memref<10x8x128xi32, #tpu.memory_space<vmem>>, vector<1x8x128xi32>
    %98 = vector.shape_cast %97 : vector<1x8x128xi32> to vector<8x128xi32>
    %cst_60 = arith.constant dense<0> : vector<8x128xi32>
    %99 = vector.multi_reduction <add>, %96, %cst_60 [0] : vector<1x8x128xi32> to vector<8x128xi32>
    %100 = arith.addi %98, %99 : vector<8x128xi32>
    %c9_61 = arith.constant 9 : index
    %c0_62 = arith.constant 0 : index
    %c0_63 = arith.constant 0 : index
    %101 = vector.load %arg3[%c9_61, %c0_62, %c0_63] : memref<10x8x128xi32, #tpu.memory_space<vmem>>, vector<1x8x128xi32>
    %102 = vector.shape_cast %101 : vector<1x8x128xi32> to vector<8x128xi32>
    %103 = vector.shape_cast %100 : vector<8x128xi32> to vector<1x8x128xi32>
    tpu.vector_store %arg3[%c9_61, %c0_62, %c0_63], %103 {strides = array<i32>} : memref<10x8x128xi32, #tpu.memory_space<vmem>>, vector<1x8x128xi32>,
    return
  }
  func.func @transform_0(%arg0: i32, %arg1: i32) -> (i32, i32, i32) {
    %c1_i32 = arith.constant 1 : i32
    %0 = arith.muli %arg0, %c1_i32 : i32
    %1 = arith.addi %0, %arg1 : i32
    %c0_i32 = arith.constant 0 : i32
    %c0_i32_0 = arith.constant 0 : i32
    %c0_i32_1 = arith.constant 0 : i32
    return %1, %c0_i32, %c0_i32_0 : i32, i32, i32
  }
  func.func @transform_1(%arg0: i32, %arg1: i32) -> (i32, i32, i32) {
    %c0_i32 = arith.constant 0 : i32
    %c0_i32_0 = arith.constant 0 : i32
    %c0_i32_1 = arith.constant 0 : i32
    return %arg0, %c0_i32, %c0_i32_0 : i32, i32, i32
  }
}

</mosaic_0001>

<bundles_post_ra>
// kernel: tpu_custom_call.1
= control target key start
LH: loop header
LB: loop body
LE: loop exit
PB: predicated region body
PF: predicated region fallthrough
CT: control target
= control target key end

     0   :  { %6 = vsyncpa [#allocation3], 0  ;;  %s667_s0 = inlined_call_operand.hbm [shape: s32[4,8,128], index: 0, kind: input, shape index: {}]   ;;  %s668_s1 = inlined_call_operand.hbm [shape: s32[20,8,128], index: 1, kind: output, shape index: {}]  }
   0x1   :  { %8 = vsyncpa [#allocation3 + $0x1], 0 }
   0x2   :  { %9 = vsyncpa [#allocation4], 0 }
   0x3   :  { %11 = vsyncpa [#allocation4 + $0x1], 0  ;;  %s546_s6 = smov 0   ;;  %s548_s7 = smov 0  }
   0x4   :  { %s550_s8 = smov 0   ;;  %s552_s9 = smov 0  }
   0x5   :  { %s554_s10 = smov 0   ;;  %s556_s11 = smov 0  }
   0x6 LB: > { %s323_s12 = sadd.s32 4294967295, %s531_s11   ;;  %s324_s13 = sadd.s32 4294967294, %s531_s11   ;;  %s531_s11 = sphi %s556_s11, %s17_s11   ;;  %s527_s10 = sphi %s554_s10, %s677_s10   ;;  %s523_s9 = sphi %s552_s9, %s676_s9   ;;  %s519_s8 = sphi %s550_s8, %s675_s8   ;;  %s515_s7 = sphi %s548_s7, %s674_s7   ;;  %s511_s6 = sphi %s546_s6, %s673_s6  }
   0x7   : > { %s29_s14 = sadd.s32 1, %s527_s10  ;;  %s38_s15 = sadd.s32 1, %s519_s8 }
   0x8   : > { %p31_p0 = scmp.ge.s32.totalorder %s29_s14, 2  ;;  %p45_p1 = scmp.ne.s32.totalorder %s519_s8, %s515_s7 }
   0x9   : > { %p46_p2 = scmp.eq.s32.totalorder %s531_s11, 0  ;;  %p51_p3 = scmp.ne.s32.totalorder %s515_s7, %s511_s6 }
   0xa   : > { %s679_s14 = smov (%p31_p0, %s29_s14), 0  ;;  %p52_p5 = scmp.eq.s32.totalorder %s323_s12, 0 }
   0xb   : > { %p587_p4 = por %p46_p2, %p45_p1  ;;  %s35_s17 = ssub.s32 %s527_s10, %s679_s14 }
   0xc   : > { %p75_p6 = scmp.eq.s32.totalorder %s323_s12, 1  ;;  %p36_p7 = scmp.eq.s32.totalorder %s35_s17, 0 }
   0xd   : > { %p593_p8 = por %p52_p5, %p51_p3  ;;  %p81_p10 = scmp.eq.s32.totalorder %s324_s13, 1 }
   0xe   : > { %p597_p9 = por %p75_p6, %p45_p1  ;;  %p326_p12 = scmp.ge.s32.totalorder %s531_s11, 2 }
   0xf   : > { %s602_s20 = scalar_select %p36_p7, %s519_s8, %s38_s15  }
  0x10   : > { %p604_p11 = por %p81_p10, %p51_p3  ;;  %p366_p13 = scmp.lt.s32.totalorder %s531_s11, 2 }
  0x11   : > { %s101_s22 = sand.u32 1, %s519_s8   ;;  %s328_s24 = sshll.u32 %s527_s10, 3 }
  0x12   : > { %s327_s23 = sshll.u32 %s101_s22, 3  ;;  %s110_s27 = scalar_lea.hbm %s667_s0, %s328_s24 }
  0x13   : > { %s105_s28 = scalar_lea.vmem [#allocation2], %s327_s23  ;;  %s112_s30 = sshll.u32 %s110_s27, 4  ;;  %s113_s30 = int_to_ptr.hbm [resolvable:$true] %s112_s30 }
  0x14   : > { %s114_s29 = sshll.u32 %s105_s28, 4  ;;  %p359_p0 = pnand %p366_p13, %p587_p4  ;;  %s115_s29 = int_to_ptr.vmem [resolvable:$true] %s114_s29 }
  0x15   : > { %p329_p1 = scmp.ge.s32.totalorder %s531_s11, 1  ;;  %p119_p2 = scmp.lt.s32.totalorder %s531_s11, 3 }
  0x16   : > { %s102_s2 = scalar_lea.sflag [#allocation3], %s101_s22 }
  0x17   : > { %361 = dma.hbm_to_vmem [thread:$0]  (!%p359_p0), %s113_s30, 128, %s115_s29, %s102_s2  }
  0x18   : > { %p120_p3 = pnand %p329_p1, %p119_p2 }
  0x19   : > { %s620_s3 = sand.u32 (!%p120_p3), 1, %s515_s7  }
  0x1a   : > { %123 = sbr.rel (%p120_p3) target bundleno = 50 (0x32), region = 24  ;;  %s330_s4 = sshll.u32 (!%p120_p3), %s620_s3, 3 }
  0x1b   : > { %s126_s5 = scalar_lea.sflag (!%p120_p3), [#allocation3], %s620_s3  ;;  %s129_s12 = scalar_lea.vmem (!%p120_p3), [#allocation2], %s330_s4 }
  0x1f   : > { %502 = dma.done.wait (%p593_p8), %s126_s5, 128  }
  0x20   : > { %504 = vsyncadd (%p593_p8), %s126_s5, 4294967168  ;;  %s353_s13 = smul.u32 80, %s620_s3  ;;  %v165_v0 = vld [vmem:[%s129_s12] sm:$0xff]  ;;  %v533_v1 = vmov 0   ;;  %s226_s24 = scalar_lea.sflag [#allocation4], %s620_s3 }
  0x21   : > { %vm166_vm0 = vcmp.eq.s32.totalorder %v165_v0, 0  ;;  %vm171_vm1 = vcmp.eq.s32.totalorder %v165_v0, 1  ;;  %vm177_vm2 = vcmp.eq.s32.totalorder %v165_v0, 2  ;;  %vm183_vm3 = vcmp.eq.s32.totalorder %v165_v0, 3  ;;  %s352_s15 = smul.u32 80, %s523_s9  ;;  %s469_s29 = scalar_lea.hbm %s668_s1, 160 }
  0x22   : > { %v167_v2 = vsel %vm166_vm0, 1, %v533_v1  ;;  %v172_v3 = vsel %vm171_vm1, 1, %v533_v1  ;;  %v178_v4 = vsel %vm177_vm2, 1, %v533_v1  ;;  %v184_v5 = vsel %vm183_vm3, 1, %v533_v1  ;;  %s148_s16 = scalar_lea.vmem [#allocation5], %s353_s13 }
  0x23   : > { %vm189_vm4 = vcmp.eq.s32.totalorder %v165_v0, 4  ;;  %vm195_vm5 = vcmp.eq.s32.totalorder %v165_v0, 5  ;;  %vm201_vm6 = vcmp.eq.s32.totalorder %v165_v0, 6  ;;  %vm207_vm7 = vcmp.eq.s32.totalorder %v165_v0, 7  ;;  %170 = vst [vmem:[%s148_s16] sm:$0xff] %v167_v2  ;;  %s237_s22 = scalar_lea.hbm %s668_s1, %s352_s15  ;;  %s238_s9 = sshll.u32 %s148_s16, 4  ;;  %s239_s9 = int_to_ptr.vmem [resolvable:$true] %s238_s9 }
  0x24   : > { %v190_v6 = vsel %vm189_vm4, 1, %v533_v1  ;;  %v196_v7 = vsel %vm195_vm5, 1, %v533_v1  ;;  %v202_v8 = vsel %vm201_vm6, 1, %v533_v1  ;;  %v208_v9 = vsel %vm207_vm7, 1, %v533_v1  ;;  %332 = vst [vmem:[%s148_s16 + $0x8] sm:$0xff] %v172_v3  ;;  %s240_s23 = sshll.u32 %s237_s22, 4  ;;  %s241_s23 = int_to_ptr.hbm [resolvable:$true] %s240_s23 }
  0x25   : > { %334 = vst [vmem:[%s148_s16 + $0x10] sm:$0xff] %v178_v4  ;;  %vm213_vm8 = vcmp.eq.s32.totalorder %v165_v0, 8  ;;  %vm219_vm9 = vcmp.eq.s32.totalorder %v165_v0, 9  ;;  %s463_s25 = sshra.s32 %s241_s23, 4  ;;  %s464_s25 = int_to_ptr.hbm [resolvable:$true] %s463_s25 }
  0x26   : > { %336 = vst [vmem:[%s148_s16 + $0x18] sm:$0xff] %v184_v5  ;;  %v214_v10 = vsel %vm213_vm8, 1, %v533_v1  ;;  %v220_v11 = vsel %vm219_vm9, 1, %v533_v1  ;;  %s465_s26 = scalar_lea.hbm %s464_s25, 80  ;;  %p470_p7 = scmp.lt.s32.totalorder %s464_s25, %s668_s1 }
  0x27   : > { %338 = vst [vmem:[%s148_s16 + $0x20] sm:$0xff] %v190_v6  ;;  %p466_p4 = scmp.ne.s32.totalorder %s464_s25, %s465_s26  ;;  %p471_p8 = scmp.lt.s32.totalorder %s469_s29, %s465_s26 }
  0x28   : > { %340 = vst [vmem:[%s148_s16 + $0x28] sm:$0xff] %v196_v7 }
  0x29   : > { %342 = vst [vmem:[%s148_s16 + $0x30] sm:$0xff] %v202_v8  ;;  %p467_p5 = pnand %p466_p4, %p597_p9  ;;  %p472_p10 = por %p471_p8, %p470_p7 }
  0x2a   : > { %344 = vst [vmem:[%s148_s16 + $0x38] sm:$0xff] %v208_v9 }
  0x2b   : > { %346 = vst [vmem:[%s148_s16 + $0x40] sm:$0xff] %v214_v10  ;;  %p468_p6 = pneg %p467_p5 }
  0x2c   : > { %348 = vst [vmem:[%s148_s16 + $0x48] sm:$0xff] %v220_v11 }
  0x2d   : > { %p473_p13 = pnand %p472_p10, %p468_p6 }
  0x2f   : > { %476 = shalt.err (!%p473_p13)
}
  0x30   : > { %s534_s3 = smov 128   ;;  %s535_s4 = smov 8  }
  0x31   : > { %356 = dma.vmem_to_hbm [thread:$0]  (%p597_p9), %s239_s9, 1280, %s241_s23, %s226_s24, %s534_s3, %s534_s3, %s535_s4  }
  0x32 PF: > { %s255_s5 = sand.u32 1, %s511_s6   ;;  %p363_p0 = pnand %p326_p12, %p604_p11 }
  0x33   : > { %s256_s12 = scalar_lea.sflag [#allocation4], %s255_s5 }
  0x34   : > { %p364_p1 = pneg %p363_p0 }
  0x36   : > { %506 = dma.done.wait (%p364_p1), %s256_s12, 1280  }
  0x37   : > { %508 = vsyncadd (%p364_p1), %s256_s12, 4294966016  ;;  %s17_s11 = sadd.s32 1, %s531_s11   ;;  %s673_s6 = smov %s515_s7 }
  0x38   : > { %p14_p2 = scmp.ge.s32.totalorder %s17_s11, 4   ;;  %s674_s7 = smov %s519_s8 }
  0x39   : > { %s675_s8 = smov %s602_s20  ;;  %s676_s9 = smov %s527_s10 }
  0x3a   : > { %s677_s10 = smov %s679_s14  ;;  %16 = sbr.rel (!%p14_p2) target bundleno = 6 (0x6), region = 82 }
  0x3f   :  { %262 = vsyncpa [#allocation3], 1 }
  0x40   :  { %264 = vsyncpa [#allocation3 + $0x1], 1 }
  0x41   :  { %265 = vsyncpa [#allocation4], 1 }
  0x42   :  { %267 = vsyncpa [#allocation4 + $0x1], 1 }

</bundles_post_ra>
